<compile_context>
chip_gen: v6e
topology: v6e:2x2x1
jax: 0.10.0
libtpu: 0.0.40
codegen_flags: <defaults>
</compile_context>

<pallas_src>
import math

import jax
import jax.numpy as jnp
from jax.experimental import pallas as pl
from jax.experimental.pallas import tpu as pltpu


def _round_up(x, m):
    return (x + m - 1) // m * m


def _stats_kernel(p_ref, w_ref, sum_ref, sq_ref):
    """Pass 1: conv tile on the MXU + global per-channel sum / sum-of-squares.

    sum_ref / sq_ref have a constant block index across the (arbitrary) grid axis,
    so they stay resident in VMEM and act as accumulators (init at step 0).
    """
    @pl.when(pl.program_id(0) == 0)
    def _():
        sum_ref[...] = jnp.zeros_like(sum_ref)
        sq_ref[...] = jnp.zeros_like(sq_ref)

    # y^T tile: (C_pad, tm) f32, with M (output pixels) on the lane axis.
    y = jnp.dot(w_ref[...], p_ref[...], preferred_element_type=jnp.float32)
    sum_ref[...] += jnp.sum(y, axis=1, keepdims=True)
    sq_ref[...] += jnp.sum(y * y, axis=1, keepdims=True)


def _apply_kernel(p_ref, w_ref, scale_ref, shift_ref, o_ref):
    """Pass 2: recompute conv tile, apply folded BN affine + ReLU (lane-dense store)."""
    y = jnp.dot(w_ref[...], p_ref[...], preferred_element_type=jnp.float32)
    o_ref[...] = jnp.maximum(y * scale_ref[...] + shift_ref[...], 0.0).astype(o_ref.dtype)


def conv_bn_relu(x_nchw, weight, gamma, beta, *, stride=(1, 1), dilation=1,
                 eps=1e-5, tm=256, compute_dtype=jnp.bfloat16):
    """Forward pass of ConvBNReLU.  x_nchw: (N, C_in, H, W); weight: (C_out, C_in, kh, kw)."""
    N, C_in, H, W = x_nchw.shape
    C_out, _, kh, kw = weight.shape
    s0, s1 = stride

    # Padding rule copied from the PyTorch module's __init__.
    if stride == (1, 1):
        p1 = math.floor(((s0 - 1) * H - s0 + kh) / 2.0)
        p2 = math.floor(((s1 - 1) * W - s1 + kw) / 2.0)
    else:
        p1, p2 = 1, 1

    H_out = (H + 2 * p1 - dilation * (kh - 1) - 1) // s0 + 1
    W_out = (W + 2 * p2 - dilation * (kw - 1) - 1) // s1 + 1

    M = N * H_out * W_out          # number of output pixels (real)
    K = C_in * kh * kw             # contraction size (real)

    # Tile / padding choices: M is the lane axis -> tile must be a multiple of 128.
    tm = max(128, _round_up(min(tm, _round_up(M, 128)), 128))
    M_pad = _round_up(M, tm)       # zero-padded pixel columns (contribute 0 to sums)
    K_pad = _round_up(K, 8)        # sublane-aligned contraction
    C_pad = _round_up(C_out, 8)    # sublane-aligned channels (zero weight/gamma/beta)

    # ---- glue: build patches^T (K, M), lane-dense along M, in the compute dtype ----
    x_pad = jnp.pad(x_nchw, ((0, 0), (0, 0), (p1, p1), (p2, p2))).astype(compute_dtype)
    taps = []
    for i in range(kh):
        for j in range(kw):
            sl = x_pad[:, :,
                       i * dilation: i * dilation + (H_out - 1) * s0 + 1: s0,
                       j * dilation: j * dilation + (W_out - 1) * s1 + 1: s1]
            taps.append(sl)                                # (N, C_in, H_out, W_out)
    pt = jnp.stack(taps, axis=0)                           # (kh*kw, N, C_in, H_out, W_out)
    pt = pt.transpose(2, 0, 1, 3, 4)                       # (C_in, kh*kw, N, H_out, W_out)
    patches_t = pt.reshape(K, M)                           # K order = (C_in, kh, kw): matches weight
    patches_t = jnp.pad(patches_t, ((0, K_pad - K), (0, M_pad - M)))

    w_t = weight.reshape(C_out, K).astype(jnp.float32)
    w_t = jnp.pad(w_t, ((0, C_pad - C_out), (0, K_pad - K))).astype(compute_dtype)

    gamma_p = jnp.pad(gamma.astype(jnp.float32), (0, C_pad - C_out)).reshape(C_pad, 1)
    beta_p = jnp.pad(beta.astype(jnp.float32), (0, C_pad - C_out)).reshape(C_pad, 1)

    n_tiles = M_pad // tm
    flops = 2 * M_pad * K_pad * C_pad
    pat_bytes = int(K_pad * M_pad * patches_t.dtype.itemsize)
    w_bytes = int(C_pad * K_pad * w_t.dtype.itemsize)

    p_spec = pl.BlockSpec((K_pad, tm), lambda i: (0, i))       # streamed, lane-dense
    w_spec = pl.BlockSpec((C_pad, K_pad), lambda i: (0, 0))    # resident weights
    vec_spec = pl.BlockSpec((C_pad, 1), lambda i: (0, 0))      # per-channel vectors

    # ---- pass 1: conv matmul + global per-channel sum / sum-of-squares ----
    sums, sqsums = pl.pallas_call(
        _stats_kernel,
        out_shape=(jax.ShapeDtypeStruct((C_pad, 1), jnp.float32),
                   jax.ShapeDtypeStruct((C_pad, 1), jnp.float32)),
        grid=(n_tiles,),
        in_specs=[p_spec, w_spec],
        out_specs=(vec_spec, vec_spec),
        compiler_params=pltpu.CompilerParams(
            dimension_semantics=("arbitrary",),          # accumulation across M tiles
            vmem_limit_bytes=32 * 1024 * 1024),
        cost_estimate=pl.CostEstimate(
            flops=flops, transcendentals=0,
            bytes_accessed=pat_bytes + w_bytes + 2 * C_pad * 4),
    )(patches_t, w_t)

    # BatchNorm batch statistics (training mode, biased variance) -> folded affine.
    # NOTE: accumulated globally across tiles in f32; zero-padded pixel columns and
    # zero-padded channels contribute nothing (padded gamma=0 -> scale=shift=0).
    mean = sums / float(M)
    var = jnp.maximum(sqsums / float(M) - mean * mean, 0.0)
    scale = gamma_p * jax.lax.rsqrt(var + eps)
    shift = beta_p - mean * scale

    # ---- pass 2: recompute conv tile, y*scale + shift, ReLU (lane-dense output) ----
    out_t = pl.pallas_call(
        _apply_kernel,
        out_shape=jax.ShapeDtypeStruct((C_pad, M_pad), jnp.float32),
        grid=(n_tiles,),
        in_specs=[p_spec, w_spec, vec_spec, vec_spec],
        out_specs=pl.BlockSpec((C_pad, tm), lambda i: (0, i)),
        compiler_params=pltpu.CompilerParams(
            dimension_semantics=("parallel",),           # megacore-shardable on v7x
            vmem_limit_bytes=32 * 1024 * 1024),
        cost_estimate=pl.CostEstimate(
            flops=flops, transcendentals=0,
            bytes_accessed=pat_bytes + w_bytes + 2 * C_pad * 4 + int(C_pad * M_pad * 4)),
    )(patches_t, w_t, scale, shift)

    # Slice off padded channels / pixels and return NCHW (transpose is over the
    # true-size output only; the big padded matrices are never transposed).
    out = out_t[:C_out, :M].reshape(C_out, N, H_out, W_out).transpose(1, 0, 2, 3)
    return out


def _reference(x_nchw, weight, gamma, beta, *, stride=(1, 1), dilation=1,
               eps=1e-5, compute_dtype=jnp.bfloat16):
    """Pure-JAX reference (conv + training-mode BN + ReLU).

    Inputs are rounded to the same compute dtype as the kernel's MXU operands so the
    only numerical difference vs. the Pallas kernel is f32 accumulation order.
    """
    N, C_in, H, W = x_nchw.shape
    C_out, _, kh, kw = weight.shape
    if stride == (1, 1):
        p1 = math.floor(((stride[0] - 1) * H - stride[0] + kh) / 2.0)
        p2 = math.floor(((stride[1] - 1) * W - stride[1] + kw) / 2.0)
    else:
        p1, p2 = 1, 1
    xc = x_nchw.astype(compute_dtype).astype(jnp.float32)
    wc = weight.astype(compute_dtype).astype(jnp.float32)
    y = jax.lax.conv_general_dilated(
        xc, wc, window_strides=stride, padding=((p1, p1), (p2, p2)),
        rhs_dilation=(dilation, dilation),
        dimension_numbers=("NCHW", "OIHW", "NCHW"),
        precision=jax.lax.Precision.HIGHEST)
    mean = jnp.mean(y, axis=(0, 2, 3), keepdims=True)
    var = jnp.mean(jnp.square(y - mean), axis=(0, 2, 3), keepdims=True)
    yhat = (y - mean) * jax.lax.rsqrt(var + eps)
    out = yhat * gamma.reshape(1, -1, 1, 1) + beta.reshape(1, -1, 1, 1)
    return jnp.maximum(out, 0.0)


if __name__ == "__main__":
    # Module config: ConvBNReLU(input_shape=(4, 16, 16), output_channels=8, kernel_shape=(3, 3))
    N, C_in, H, W = 2, 4, 16, 16
    C_out, kh, kw = 8, 3, 3

    key = jax.random.PRNGKey(0)
    kx, kw_key = jax.random.split(key)
    x = jax.random.normal(kx, (N, C_in, H, W), dtype=jnp.float32)
    weight = jax.random.normal(kw_key, (C_out, C_in, kh, kw), dtype=jnp.float32) * 0.1
    gamma = jnp.ones((C_out,), dtype=jnp.float32)   # BatchNorm2d weight init
    beta = jnp.zeros((C_out,), dtype=jnp.float32)   # BatchNorm2d bias init

    out = jax.block_until_ready(conv_bn_relu(x, weight, gamma, beta))
    ref = jax.block_until_ready(_reference(x, weight, gamma, beta))

    assert out.shape == (N, C_out, H, W), out.shape
    max_err = float(jnp.max(jnp.abs(out - ref)))
    assert jnp.allclose(out, ref, rtol=5e-3, atol=5e-3), max_err

    print("KERNEL_OK")
</pallas_src>

<mosaic_0001>
module attributes {stable_mosaic.version = 11 : i64} {
  func.func @_stats_kernel(%arg0: i32, %arg1: memref<40x256xbf16, #tpu.memory_space<vmem>>, %arg2: memref<8x40xbf16, #tpu.memory_space<vmem>>, %arg3: memref<8x1xf32, #tpu.memory_space<vmem>>, %arg4: memref<8x1xf32, #tpu.memory_space<vmem>>) attributes {dimension_semantics = [#tpu.dimension_semantics<arbitrary>], iteration_bounds = array<i64: 2>, scalar_prefetch = 0 : i64, scratch_operands = 0 : i64, tpu.core_type = #tpu.core_type<tc>, window_params = [{transform_indices = @transform_0, window_bounds = array<i64: 40, 256>}, {pipeline_mode = #tpu.pipeline_mode<synchronous>, transform_indices = @transform_1, window_bounds = array<i64: 8, 40>}, {pipeline_mode = #tpu.pipeline_mode<synchronous>, transform_indices = @transform_2, window_bounds = array<i64: 8, 1>}, {pipeline_mode = #tpu.pipeline_mode<synchronous>, transform_indices = @transform_3, window_bounds = array<i64: 8, 1>}]} {
    %c0_i32 = arith.constant 0 : i32
    %0 = arith.cmpi eq, %arg0, %c0_i32 : i32
    %1 = arith.extui %0 : i1 to i32
    %c0_i32_0 = arith.constant 0 : i32
    %2 = arith.cmpi ne, %1, %c0_i32_0 : i32
    scf.if %2 {
      %cst_14 = arith.constant 0.000000e+00 : f32
      %17 = vector.broadcast %cst_14 : f32 to vector<8x1xf32>
      %c0_15 = arith.constant 0 : index
      %c0_16 = arith.constant 0 : index
      %18 = vector.load %arg3[%c0_15, %c0_16] : memref<8x1xf32, #tpu.memory_space<vmem>>, vector<8x1xf32>
      tpu.vector_store %arg3[%c0_15, %c0_16], %17 {strides = array<i32>} : memref<8x1xf32, #tpu.memory_space<vmem>>, vector<8x1xf32>,
      %cst_17 = arith.constant 0.000000e+00 : f32
      %19 = vector.broadcast %cst_17 : f32 to vector<8x1xf32>
      %c0_18 = arith.constant 0 : index
      %c0_19 = arith.constant 0 : index
      %20 = vector.load %arg4[%c0_18, %c0_19] : memref<8x1xf32, #tpu.memory_space<vmem>>, vector<8x1xf32>
      tpu.vector_store %arg4[%c0_18, %c0_19], %19 {strides = array<i32>} : memref<8x1xf32, #tpu.memory_space<vmem>>, vector<8x1xf32>,
    } else {
    }
    %c0 = arith.constant 0 : index
    %c0_1 = arith.constant 0 : index
    %3 = vector.load %arg2[%c0, %c0_1] : memref<8x40xbf16, #tpu.memory_space<vmem>>, vector<8x40xbf16>
    %c0_2 = arith.constant 0 : index
    %c0_3 = arith.constant 0 : index
    %4 = vector.load %arg1[%c0_2, %c0_3] : memref<40x256xbf16, #tpu.memory_space<vmem>>, vector<40x256xbf16>
    %cst = arith.constant dense<0.000000e+00> : vector<8x256xf32>
    %5 = tpu.matmul %3, %4, %cst {dimension_numbers = #tpu.dot_dimension_numbers<[1], [0], [0], [1], [0, 0, 1, 1], [], []>} : vector<8x40xbf16>, vector<40x256xbf16>, vector<8x256xf32> -> vector<8x256xf32>
    %c0_4 = arith.constant 0 : index
    %c0_5 = arith.constant 0 : index
    %6 = vector.load %arg3[%c0_4, %c0_5] : memref<8x1xf32, #tpu.memory_space<vmem>>, vector<8x1xf32>
    %cst_6 = arith.constant dense<0.000000e+00> : vector<8xf32>
    %7 = vector.multi_reduction <add>, %5, %cst_6 [1] : vector<8x256xf32> to vector<8xf32>
    %8 = vector.shape_cast %7 : vector<8xf32> to vector<8x1xf32>
    %9 = arith.addf %6, %8 : vector<8x1xf32>
    %c0_7 = arith.constant 0 : index
    %c0_8 = arith.constant 0 : index
    %10 = vector.load %arg3[%c0_7, %c0_8] : memref<8x1xf32, #tpu.memory_space<vmem>>, vector<8x1xf32>
    tpu.vector_store %arg3[%c0_7, %c0_8], %9 {strides = array<i32>} : memref<8x1xf32, #tpu.memory_space<vmem>>, vector<8x1xf32>,
    %c0_9 = arith.constant 0 : index
    %c0_10 = arith.constant 0 : index
    %11 = vector.load %arg4[%c0_9, %c0_10] : memref<8x1xf32, #tpu.memory_space<vmem>>, vector<8x1xf32>
    %12 = arith.mulf %5, %5 : vector<8x256xf32>
    %cst_11 = arith.constant dense<0.000000e+00> : vector<8xf32>
    %13 = vector.multi_reduction <add>, %12, %cst_11 [1] : vector<8x256xf32> to vector<8xf32>
    %14 = vector.shape_cast %13 : vector<8xf32> to vector<8x1xf32>
    %15 = arith.addf %11, %14 : vector<8x1xf32>
    %c0_12 = arith.constant 0 : index
    %c0_13 = arith.constant 0 : index
    %16 = vector.load %arg4[%c0_12, %c0_13] : memref<8x1xf32, #tpu.memory_space<vmem>>, vector<8x1xf32>
    tpu.vector_store %arg4[%c0_12, %c0_13], %15 {strides = array<i32>} : memref<8x1xf32, #tpu.memory_space<vmem>>, vector<8x1xf32>,
    return
  }
  func.func @transform_0(%arg0: i32) -> (i32, i32) {
    %c0_i32 = arith.constant 0 : i32
    %c0_i32_0 = arith.constant 0 : i32
    return %c0_i32, %arg0 : i32, i32
  }
  func.func @transform_1(%arg0: i32) -> (i32, i32) {
    %c0_i32 = arith.constant 0 : i32
    %c0_i32_0 = arith.constant 0 : i32
    %c0_i32_1 = arith.constant 0 : i32
    return %c0_i32, %c0_i32_0 : i32, i32
  }
  func.func @transform_2(%arg0: i32) -> (i32, i32) {
    %c0_i32 = arith.constant 0 : i32
    %c0_i32_0 = arith.constant 0 : i32
    %c0_i32_1 = arith.constant 0 : i32
    return %c0_i32, %c0_i32_0 : i32, i32
  }
  func.func @transform_3(%arg0: i32) -> (i32, i32) {
    %c0_i32 = arith.constant 0 : i32
    %c0_i32_0 = arith.constant 0 : i32
    %c0_i32_1 = arith.constant 0 : i32
    return %c0_i32, %c0_i32_0 : i32, i32
  }
}

</mosaic_0001>

<bundles_post_ra>
// kernel: tpu_custom_call.1
= control target key start
LH: loop header
LB: loop body
LE: loop exit
PB: predicated region body
PF: predicated region fallthrough
CT: control target
= control target key end

     0   :  { %9 = vsyncpa [#allocation3], 0  ;;  %s707_s0 = inlined_call_operand.hbm [shape: bf16[40,512], index: 0, kind: input, shape index: {}]   ;;  %s708_s1 = inlined_call_operand.hbm [shape: bf16[8,40], index: 1, kind: input, shape index: {}]   ;;  %s709_s2 = inlined_call_operand.vmem [shape: f32[8,1], index: 2, kind: output, shape index: {0}]   ;;  %s710_s3 = inlined_call_operand.vmem [shape: f32[8,1], index: 3, kind: output, shape index: {1}]  }
   0x1   :  { %11 = vsyncpa [#allocation3 + $0x1], 0 }
   0x2   :  { %12 = vsyncpa [#allocation5], 0  ;;  %s555_s12 = smov 0   ;;  %s557_s13 = smov 0  }
   0x3   :  { %s559_s14 = smov 0   ;;  %s561_s15 = smov 0  }
   0x4 LB: > { %s349_s16 = sadd.s32 4294967295, %s526_s15   ;;  %s575_s17 = sadd.s32 1, %s526_s15   ;;  %s526_s15 = sphi %s561_s15, %s729_s15   ;;  %s522_s14 = sphi %s559_s14, %s728_s14   ;;  %s518_s13 = sphi %s557_s13, %s727_s13   ;;  %s514_s12 = sphi %s555_s12, %s726_s12  }
   0x5   : > { %s22_s18 = ssub.s32 %s526_s15, %s575_s17  ;;  %s25_s19 = sadd.s32 1, %s522_s14 }
   0x6   : > { %p23_p0 = scmp.eq.s32.totalorder %s22_s18, 0  ;;  %p32_p1 = scmp.ne.s32.totalorder %s522_s14, %s518_s13 }
   0x7   : > { %p33_p2 = scmp.eq.s32.totalorder %s526_s15, 0  ;;  %p38_p3 = scmp.ne.s32.totalorder %s518_s13, %s514_s12 }
   0x8   : > { %s585_s20 = scalar_select %p23_p0, %s522_s14, %s25_s19  }
   0x9   : > { %p587_p4 = por %p33_p2, %p32_p1  ;;  %p591_p5 = scmp.eq.s32.totalorder %s349_s16, 0 }
   0xa   : > { %p350_p6 = scmp.ge.s32.totalorder %s526_s15, 1  ;;  %p112_p7 = scmp.lt.s32.totalorder %s526_s15, 3 }
   0xb   : > { %s716_s22 = scalar_select %p591_p5, 1, 0 }
   0xc   : > { %p599_p8 = por %p591_p5, %p38_p3  ;;  %p603_p9 = scmp.ne.s32.totalorder %s349_s16, 0 }
   0xd   : > { %p607_p10 = pnand %p350_p6, %p112_p7  ;;  %s528_s26 = smov [#allocation4]  }
   0xe   : > { %s717_s23 = scalar_select %p599_p8, 1, 0 }
   0xf   : > { %s718_s24 = scalar_select %p603_p9, 1, 0 }
  0x10   : > { %s719_s25 = scalar_select %p607_p10, 1, 0 }
  0x11   : > { %s125_s27 = sshll.u32 %s528_s26, 4  ;;  %p377_p11 = pneg %p607_p10  ;;  %s126_s27 = int_to_ptr.vmem [resolvable:$true] %s125_s27 }
  0x12   : > { %p386_p12 = scmp.lt.s32.totalorder %s526_s15, 2  ;;  %s136_s28 = sand.u32 1, %s522_s14  }
  0x13   : > { %p617_p13 = pnand %p377_p11, %p591_p5  ;;  %s369_s4 = smul.u32 40, %s136_s28 }
  0x14   : > { %p623_p0 = pnand %p386_p12, %p587_p4  ;;  %s368_s5 = sshll.u32 %s526_s15, 7 }
  0x15   : > { %p436_p1 = pneg %p617_p13  ;;  %s445_s6 = scalar_lea.vmem %s126_s27, 64 }
  0x16   : > { %p446_p2 = scmp.ne.s32.totalorder %s126_s27, %s445_s6  ;;  %p453_p7 = scmp.lt.s32.totalorder %s126_s27, %s126_s27 }
  0x17   : > { %p454_p9 = scmp.lt.s32.totalorder %s445_s6, %s445_s6 }
  0x18   : > { %p448_p3 = pnand %p446_p2, %p436_p1 }
  0x19   : > { %p455_p11 = por %p454_p9, %p453_p7 }
  0x1a   : > { %p449_p6 = pneg %p448_p3 }
  0x1c   : > { %p456_p5 = pnand %p455_p11, %p449_p6 }
  0x1e   : > { %459 = shalt.err (!%p456_p5)
}
  0x1f   : > { %380 = dma.hbm_to_vmem [thread:$0]  (!%p617_p13), %s708_s1, 64, %s126_s27, [#allocation5]  }
  0x20   : > { %s638_s11 = scalar_lea.hbm %s707_s0, %s368_s5  ;;  %s140_s12 = scalar_lea.vmem [#allocation2], %s369_s4 }
  0x21   : > { %s147_s15 = sshll.u32 %s140_s12, 4  ;;  %s642_s16 = scalar_lea.sflag [#allocation3], %s136_s28  ;;  %s640_s15 = int_to_ptr.vmem [resolvable:$true] %s147_s15 }
  0x22   : > { %s460_s18 = scalar_lea.hbm %s638_s11, 640  ;;  %p462_p5 = pneg %p623_p0 }
  0x23   : > { %p461_p4 = scmp.ne.s32.totalorder %s638_s11, %s460_s18  ;;  %s465_s26 = scalar_lea.hbm %s707_s0, 1280 }
  0x24   : > { %p466_p13 = scmp.lt.s32.totalorder %s638_s11, %s707_s0  ;;  %p467_p1 = scmp.lt.s32.totalorder %s465_s26, %s460_s18 }
  0x25   : > { %p463_p9 = pnand %p462_p5, %p461_p4 }
  0x26   : > { %p468_p2 = por %p467_p1, %p466_p13 }
  0x27   : > { %p464_p12 = pneg %p463_p9 }
  0x29   : > { %p469_p3 = pnand %p468_p2, %p464_p12 }
  0x2b   : > { %472 = shalt.err (!%p469_p3)
}
  0x2c   : > { %s473_s28 = scalar_lea.vmem %s640_s15, 640  ;;  %s529_s4 = smov [#allocation2]  }
  0x2d   : > { %p474_p6 = scmp.ne.s32.totalorder %s640_s15, %s473_s28  ;;  %s478_s5 = sshll.u32 %s529_s4, 4  ;;  %s479_s5 = int_to_ptr.vmem [resolvable:$false] %s478_s5 }
  0x2e   : > { %s480_s6 = scalar_lea.vmem %s479_s5, 1280  ;;  %p481_p4 = scmp.lt.s32.totalorder %s640_s15, %s479_s5 }
  0x2f   : > { %p476_p7 = pnand %p474_p6, %p462_p5  ;;  %p482_p9 = scmp.lt.s32.totalorder %s480_s6, %s473_s28 }
  0x31   : > { %p477_p11 = pneg %p476_p7  ;;  %p483_p8 = por %p482_p9, %p481_p4 }
  0x33   : > { %p484_p10 = pnand %p483_p8, %p477_p11 }
  0x35   : > { %487 = shalt.err (!%p484_p10)
}
  0x36   : > { %s530_s7 = smov 256   ;;  %s531_s8 = smov 128  }
  0x37   : > { %s532_s9 = smov 8   ;;  %p722_p5 = scmp.ne.s32.totalorder %s719_s25, 0 }
  0x38   : > { %384 = dma.hbm_to_vmem [thread:$0]  (!%p623_p0), %s638_s11, 640, %s640_s15, %s642_s16, %s530_s7, %s531_s8, %s532_s9  }
  0x39   : > { %159 = sbr.rel (%p722_p5) target bundleno = 432 (0x1b0), region = 28  ;;  %s161_s10 = sand.u32 (!%p722_p5), 1, %s518_s13  }
  0x3a   : > { %s370_s12 = smul.u32 (!%p722_p5), 40, %s161_s10  ;;  %s162_s18 = scalar_lea.sflag (!%p722_p5), [#allocation3], %s161_s10 }
  0x3b   : > { %p723_p8 = scmp.ne.s32.totalorder (!%p722_p5), %s717_s23, 0 }
  0x3c   : > { %s165_s19 = scalar_lea.vmem (!%p722_p5), [#allocation2], %s370_s12 }
  0x3e   : > { %505 = dma.done.wait (%p723_p8), %s162_s18, 640  }
  0x3f   : > { %507 = vsyncadd (%p723_p8), %s162_s18, 4294966656  ;;  %p724_p10 = scmp.ne.s32.totalorder %s716_s22, 0 }
  0x41   : > { %509 = dma.done.wait (%p724_p10), [#allocation5], 64  }
  0x42   : > { %511 = vsyncadd (%p724_p10), [#allocation5], 4294967232  ;;  %p725_p0 = scmp.ne.s32.totalorder %s718_s24, 0 }
  0x44   : > { %192 = sbr.rel (%p725_p0) target bundleno = 75 (0x4b), region = 40 }
  0x49   : > { %vm193_vm0 = vcmask 7168   ;;  %v533_v0 = vmov 0.0  }
  0x4a   : > { %194 = vst.msk [vmem:[%s709_s2] sm:$0xff] %vm193_vm0, %v533_v0  ;;  %195 = vst.msk [vmem:[%s710_s3] sm:$0xff] %vm193_vm0, %v533_v0 }
  0x4b PF: > { %v201_v1 = vld [vmem:[%s165_s19 + $0x20] sm:$0xff]  ;;  %vm231_vm1 = vcmask 1043456   ;;  %v428_v4 = vld [vmem:[%s165_s19 + $0x14] ss:$8 sps:$4 sm:$0xff]   ;;  %v534_v5 = vmov 0   ;;  %vm227_vm2 = vcmask 326656  }
  0x4c   : > { %v363_v2 = vcombine.high %v201_v1, %v201_v1  ;;  %v362_v3 = vcombine.low %v201_v1, %v201_v1  ;;  %270 = vmatprep.mubr.bf16.mxu0 %v534_v5  ;;  %v430_v7 = vld [vmem:[%s165_s19 + $0x10] ss:$8 sps:$4 sm:$0xff]   ;;  %v431_v8 = vld [vmem:[%s165_s19 + $0x4] ss:$8 sps:$4 sm:$0xff]   ;;  %v433_v9 = vld [vmem:[%s165_s19] ss:$8 sps:$4 sm:$0xff]  }
  0x4d   : > { %v196_v10 = vld [vmem:[#allocation4] sm:$0xf]  ;;  %vm284_vm3 = vcmask 7168  }
  0x4e   : > { %364 = vmatprep.subr.msk.bf16.mxu0 %vm231_vm1, %v363_v2  ;;  %v233_v6 = vsel %vm231_vm1, %v362_v3, 0 }
  0x4f   : > { %249 = vmatpush1.bf16.msra.mxu0 %v233_v6 }
  0x50   : > { %250 = vmatprep.subr.bf16.mxu0 %v428_v4 }
  0x51   : > { %v279_v19 = vld [vmem:[%s709_s2] sm:$0xff] }
  0x52   : > { %v286_v22 = vld [vmem:[%s710_s3] sm:$0xff] }
  0x53   : > { %251 = vmatpush1.bf16.msra.mxu0 %v430_v7 }
  0x54   : > { %252 = vmatprep.subr.bf16.mxu0 %v431_v8 }
  0x57   : > { %253 = vmatpush1.bf16.msra.mxu0 %v433_v9 }
  0x5a   : > { %365 = vmatmul.mubr.msk.bf16.vlgmr.msra.gmra.mxu0 %vm227_vm2, %v196_v10 }
 0x11a   : > { %v272_v11 = vpop.f32.mrf.mxu0 }
 0x11b   : > { %v287_v16 = vmul.f32 %v272_v11, %v272_v11 }
 0x11c   : > { %v274_v12 = vpop.f32.mrf.mxu0 }
 0x11d   : > { %v288_v13 = vmul.f32 %v274_v12, %v274_v12  ;;  %v280_v14 = vadd.f32 %v274_v12, %v272_v11 }
 0x11e   : > { %v276_v15 = vpop.f32.mrf.mxu0 }
 0x11f   : > { %281 = vadd.xlane.f32.xlu0 %v280_v14  ;;  %v289_v18 = vadd.f32 %v288_v13, %v287_v16 }
 0x120   : > { %v277_v17 = vpop.f32.mrf.mxu0 }
 0x123   : > { %290 = vadd.xlane.f32.xlu0 %v289_v18 }
 0x1a8   : > { %v282_v20 = vpop.xlane.xlu0 %281 }
 0x1a9   : > { %v283_v21 = vadd.f32 %v282_v20, %v279_v19 }
 0x1ab   : > { %285 = vst.msk [vmem:[%s709_s2] sm:$0xff] %vm284_vm3, %v283_v21 }
 0x1ac   : > { %v291_v23 = vpop.xlane.xlu0 %290 }
 0x1ad   : > { %v292_v24 = vadd.f32 %v291_v23, %v286_v22 }
 0x1af   : > { %293 = vst.msk [vmem:[%s710_s3] sm:$0xff] %vm284_vm3, %v292_v24 }
 0x1b0 PF: > { %p15_p12 = scmp.ge.s32.totalorder %s575_s17, 4   ;;  %s726_s12 = smov %s518_s13 }
 0x1b1   : > { %s727_s13 = smov %s522_s14  ;;  %s728_s14 = smov %s585_s20 }
 0x1b2   : > { %s729_s15 = smov %s575_s17  ;;  %17 = sbr.rel (!%p15_p12) target bundleno = 4 (0x4), region = 80 }
 0x1b7   :  { %311 = vsyncpa [#allocation3], 1 }
 0x1b8   :  { %313 = vsyncpa [#allocation3 + $0x1], 1 }
 0x1b9   :  { %314 = vsyncpa [#allocation5], 1 }

</bundles_post_ra>
